<compile_context>
chip_gen: v5e
topology: v5e:2x2
jax: 0.10.0
libtpu: 0.0.40
codegen_flags: <defaults>
</compile_context>

<pallas_src>
import functools

import jax
import jax.numpy as jnp
from jax.experimental import pallas as pl
from jax.experimental.pallas import tpu as pltpu


def _kmax_kernel(x_ref, o_ref, *, k: int):
    x = x_ref[...]                       # (L, R): L on sublanes, rows on lanes
    L, R = x.shape

    sub = jax.lax.broadcasted_iota(jnp.int32, (L, R), 0)
    if jnp.issubdtype(x.dtype, jnp.floating):
        masked_val = jnp.array(-jnp.inf, dtype=x.dtype)
    else:
        masked_val = jnp.array(jnp.iinfo(x.dtype).min, dtype=x.dtype)

    # --- selection: pick the k largest values per row (lane), remembering each
    # pick's value and its position along L. k is small & static -> unrolled.
    work = x
    maxes = []                           # k x (1, R) picked values
    firsts = []                          # k x (1, R) int32 picked indices
    for _ in range(k):
        m = jnp.max(work, axis=0, keepdims=True)           # (1, R)
        is_max = work == m
        pos = jnp.where(is_max, sub, jnp.int32(L))
        first = jnp.min(pos, axis=0, keepdims=True)        # smallest tied index
        chosen = sub == first
        work = jnp.where(chosen, masked_val, work)
        maxes.append(m)
        firsts.append(first)

    # --- restore original sequence order: rank_t = #{s : first_s <= first_t}
    # is an exact int32 permutation of 1..k (k^2 compares on (1, R) vectors; no
    # L x L matmul, no extra L-wide reductions, exact integer equality).
    ranks = []
    for t in range(k):
        r = (firsts[0] <= firsts[t]).astype(jnp.int32)
        for s in range(1, k):
            r = r + (firsts[s] <= firsts[t]).astype(jnp.int32)
        ranks.append(r)

    # Scatter the k picked values into output row (rank_t - 1); lane-dense.
    row_idx = jax.lax.broadcasted_iota(jnp.int32, (k, R), 0)
    out = jnp.zeros((k, R), dtype=x.dtype)
    for t in range(k):
        out = jnp.where(row_idx == ranks[t] - 1, maxes[t], out)

    o_ref[...] = out.astype(o_ref.dtype)


def _round_up(n: int, m: int) -> int:
    return ((n + m - 1) // m) * m


def kmax_pool1d(x: jax.Array, k: int) -> jax.Array:
    """KMaxPool1d forward. x: (B, C, L) -> (B, C, k)."""
    B, C, L = x.shape
    rows = B * C

    # Lane-dense row tile: multiple of 128, up to 512 rows per grid step, capped
    # so the double-buffered (L, row_tile) input block stays around 2 MiB
    # (keeps the per-step working set comfortably inside default scoped VMEM,
    # including the 64 MiB v7x budget).
    itemsize = jnp.dtype(x.dtype).itemsize
    budget = 2 * 1024 * 1024
    cap = max(128, ((budget // max(L * itemsize, 1)) // 128) * 128)
    row_tile = min(512, cap, _round_up(rows, 128))
    rows_padded = _round_up(rows, row_tile)

    x2 = x.reshape(rows, L)
    if rows_padded != rows:
        x2 = jnp.pad(x2, ((0, rows_padded - rows), (0, 0)))
    x2t = jnp.swapaxes(x2, 0, 1)         # (L, rows_padded): rows on lanes

    grid = (rows_padded // row_tile,)
    out_t = pl.pallas_call(
        functools.partial(_kmax_kernel, k=k),
        out_shape=jax.ShapeDtypeStruct((k, rows_padded), x.dtype),
        grid_spec=pltpu.PrefetchScalarGridSpec(
            num_scalar_prefetch=0,
            grid=grid,
            in_specs=[pl.BlockSpec((L, row_tile), lambda i: (0, i))],
            out_specs=pl.BlockSpec((k, row_tile), lambda i: (0, i)),
        ),
        compiler_params=pltpu.CompilerParams(
            dimension_semantics=("parallel",)),
    )(x2t)

    # Layout plumbing back to (B, C, k); padded lanes are dropped here.
    return jnp.swapaxes(out_t[:, :rows], 0, 1).reshape(B, C, k)


def kmax_pool1d_ref(x: jax.Array, k: int) -> jax.Array:
    """Pure-JAX reference mirroring the PyTorch module."""
    _, idx = jax.lax.top_k(x, k)
    idx_sorted = jnp.sort(idx, axis=-1)
    return jnp.take_along_axis(x, idx_sorted, axis=-1)


# TODO(synk): rows containing NaN, or rows where -inf itself lands in the top-k,
# diverge from torch.topk gather semantics (same limitation as the previous
# version); all finite inputs match exactly.

if __name__ == "__main__":
    key = jax.random.PRNGKey(0)
    B, C, L, K = 2, 4, 16, 3
    x = jax.random.normal(key, (B, C, L), dtype=jnp.float32)

    out = kmax_pool1d(x, K)
    out = jax.block_until_ready(out)

    ref = kmax_pool1d_ref(x, K)
    assert out.shape == (B, C, K), out.shape
    assert jnp.allclose(out, ref, atol=1e-6), (out, ref)

    # Shape whose B*C is not a multiple of the tile (exercises the pad path).
    x2 = jax.random.normal(jax.random.PRNGKey(1), (3, 5, 32), dtype=jnp.float32)
    out2 = jax.block_until_ready(kmax_pool1d(x2, 4))
    assert jnp.allclose(out2, kmax_pool1d_ref(x2, 4), atol=1e-6)

    print("KERNEL_OK")
</pallas_src>

<mosaic_0001>
module attributes {stable_mosaic.version = 11 : i64} {
  func.func @_kmax_kernel(%arg0: i32, %arg1: memref<16x128xf32, #tpu.memory_space<vmem>>, %arg2: memref<3x128xf32, #tpu.memory_space<vmem>>) attributes {dimension_semantics = [#tpu.dimension_semantics<parallel>], iteration_bounds = array<i64: 1>, scalar_prefetch = 0 : i64, scratch_operands = 0 : i64, tpu.core_type = #tpu.core_type<tc>, window_params = [{transform_indices = @transform_0, window_bounds = array<i64: 16, 128>}, {transform_indices = @transform_1, window_bounds = array<i64: 3, 128>}]} {
    %c0 = arith.constant 0 : index
    %c0_0 = arith.constant 0 : index
    %0 = vector.load %arg1[%c0, %c0_0] : memref<16x128xf32, #tpu.memory_space<vmem>>, vector<16x128xf32>
    %1 = tpu.iota {dimensions = array<i32: 0>} : vector<16x128xi32>
    %cst = arith.constant dense<0xFF800000> : vector<128xf32>
    %2 = vector.multi_reduction <maximumf>, %0, %cst [0] : vector<16x128xf32> to vector<128xf32>
    %3 = vector.shape_cast %2 : vector<128xf32> to vector<1x128xf32>
    %4 = vector.broadcast %3 : vector<1x128xf32> to vector<16x128xf32>
    %5 = arith.cmpf oeq, %0, %4 : vector<16x128xf32>
    %c16_i32 = arith.constant 16 : i32
    %6 = vector.broadcast %c16_i32 : i32 to vector<16x128xi32>
    %7 = arith.select %5, %1, %6 : vector<16x128xi1>, vector<16x128xi32>
    %cst_1 = arith.constant dense<2147483647> : vector<128xi32>
    %8 = vector.multi_reduction <minsi>, %7, %cst_1 [0] : vector<16x128xi32> to vector<128xi32>
    %9 = vector.shape_cast %8 : vector<128xi32> to vector<1x128xi32>
    %10 = vector.broadcast %9 : vector<1x128xi32> to vector<16x128xi32>
    %11 = arith.cmpi eq, %1, %10 : vector<16x128xi32>
    %cst_2 = arith.constant 0xFF800000 : f32
    %12 = vector.broadcast %cst_2 : f32 to vector<16x128xf32>
    %13 = arith.select %11, %12, %0 : vector<16x128xi1>, vector<16x128xf32>
    %cst_3 = arith.constant dense<0xFF800000> : vector<128xf32>
    %14 = vector.multi_reduction <maximumf>, %13, %cst_3 [0] : vector<16x128xf32> to vector<128xf32>
    %15 = vector.shape_cast %14 : vector<128xf32> to vector<1x128xf32>
    %16 = vector.broadcast %15 : vector<1x128xf32> to vector<16x128xf32>
    %17 = arith.cmpf oeq, %13, %16 : vector<16x128xf32>
    %c16_i32_4 = arith.constant 16 : i32
    %18 = vector.broadcast %c16_i32_4 : i32 to vector<16x128xi32>
    %19 = arith.select %17, %1, %18 : vector<16x128xi1>, vector<16x128xi32>
    %cst_5 = arith.constant dense<2147483647> : vector<128xi32>
    %20 = vector.multi_reduction <minsi>, %19, %cst_5 [0] : vector<16x128xi32> to vector<128xi32>
    %21 = vector.shape_cast %20 : vector<128xi32> to vector<1x128xi32>
    %22 = vector.broadcast %21 : vector<1x128xi32> to vector<16x128xi32>
    %23 = arith.cmpi eq, %1, %22 : vector<16x128xi32>
    %cst_6 = arith.constant 0xFF800000 : f32
    %24 = vector.broadcast %cst_6 : f32 to vector<16x128xf32>
    %25 = arith.select %23, %24, %13 : vector<16x128xi1>, vector<16x128xf32>
    %cst_7 = arith.constant dense<0xFF800000> : vector<128xf32>
    %26 = vector.multi_reduction <maximumf>, %25, %cst_7 [0] : vector<16x128xf32> to vector<128xf32>
    %27 = vector.shape_cast %26 : vector<128xf32> to vector<1x128xf32>
    %28 = vector.broadcast %27 : vector<1x128xf32> to vector<16x128xf32>
    %29 = arith.cmpf oeq, %25, %28 : vector<16x128xf32>
    %c16_i32_8 = arith.constant 16 : i32
    %30 = vector.broadcast %c16_i32_8 : i32 to vector<16x128xi32>
    %31 = arith.select %29, %1, %30 : vector<16x128xi1>, vector<16x128xi32>
    %cst_9 = arith.constant dense<2147483647> : vector<128xi32>
    %32 = vector.multi_reduction <minsi>, %31, %cst_9 [0] : vector<16x128xi32> to vector<128xi32>
    %33 = vector.shape_cast %32 : vector<128xi32> to vector<1x128xi32>
    %34 = arith.cmpi sle, %9, %9 : vector<1x128xi32>
    %35 = arith.extui %34 : vector<1x128xi1> to vector<1x128xi32>
    %36 = arith.cmpi sle, %21, %9 : vector<1x128xi32>
    %37 = arith.extui %36 : vector<1x128xi1> to vector<1x128xi32>
    %38 = arith.addi %35, %37 : vector<1x128xi32>
    %39 = arith.cmpi sle, %33, %9 : vector<1x128xi32>
    %40 = arith.extui %39 : vector<1x128xi1> to vector<1x128xi32>
    %41 = arith.addi %38, %40 : vector<1x128xi32>
    %42 = arith.cmpi sle, %9, %21 : vector<1x128xi32>
    %43 = arith.extui %42 : vector<1x128xi1> to vector<1x128xi32>
    %44 = arith.cmpi sle, %21, %21 : vector<1x128xi32>
    %45 = arith.extui %44 : vector<1x128xi1> to vector<1x128xi32>
    %46 = arith.addi %43, %45 : vector<1x128xi32>
    %47 = arith.cmpi sle, %33, %21 : vector<1x128xi32>
    %48 = arith.extui %47 : vector<1x128xi1> to vector<1x128xi32>
    %49 = arith.addi %46, %48 : vector<1x128xi32>
    %50 = arith.cmpi sle, %9, %33 : vector<1x128xi32>
    %51 = arith.extui %50 : vector<1x128xi1> to vector<1x128xi32>
    %52 = arith.cmpi sle, %21, %33 : vector<1x128xi32>
    %53 = arith.extui %52 : vector<1x128xi1> to vector<1x128xi32>
    %54 = arith.addi %51, %53 : vector<1x128xi32>
    %55 = arith.cmpi sle, %33, %33 : vector<1x128xi32>
    %56 = arith.extui %55 : vector<1x128xi1> to vector<1x128xi32>
    %57 = arith.addi %54, %56 : vector<1x128xi32>
    %58 = tpu.iota {dimensions = array<i32: 0>} : vector<3x128xi32>
    %cst_10 = arith.constant 0.000000e+00 : f32
    %59 = vector.broadcast %cst_10 : f32 to vector<3x128xf32>
    %c1_i32 = arith.constant 1 : i32
    %60 = vector.broadcast %c1_i32 : i32 to vector<1x128xi32>
    %61 = arith.subi %41, %60 : vector<1x128xi32>
    %62 = vector.broadcast %61 : vector<1x128xi32> to vector<3x128xi32>
    %63 = arith.cmpi eq, %58, %62 : vector<3x128xi32>
    %64 = vector.shape_cast %3 : vector<1x128xf32> to vector<1x128xf32>
    %65 = vector.broadcast %64 : vector<1x128xf32> to vector<3x128xf32>
    %66 = arith.select %63, %65, %59 : vector<3x128xi1>, vector<3x128xf32>
    %c1_i32_11 = arith.constant 1 : i32
    %67 = vector.broadcast %c1_i32_11 : i32 to vector<1x128xi32>
    %68 = arith.subi %49, %67 : vector<1x128xi32>
    %69 = vector.broadcast %68 : vector<1x128xi32> to vector<3x128xi32>
    %70 = arith.cmpi eq, %58, %69 : vector<3x128xi32>
    %71 = vector.shape_cast %15 : vector<1x128xf32> to vector<1x128xf32>
    %72 = vector.broadcast %71 : vector<1x128xf32> to vector<3x128xf32>
    %73 = arith.select %70, %72, %66 : vector<3x128xi1>, vector<3x128xf32>
    %c1_i32_12 = arith.constant 1 : i32
    %74 = vector.broadcast %c1_i32_12 : i32 to vector<1x128xi32>
    %75 = arith.subi %57, %74 : vector<1x128xi32>
    %76 = vector.broadcast %75 : vector<1x128xi32> to vector<3x128xi32>
    %77 = arith.cmpi eq, %58, %76 : vector<3x128xi32>
    %78 = vector.shape_cast %27 : vector<1x128xf32> to vector<1x128xf32>
    %79 = vector.broadcast %78 : vector<1x128xf32> to vector<3x128xf32>
    %80 = arith.select %77, %79, %73 : vector<3x128xi1>, vector<3x128xf32>
    %c0_13 = arith.constant 0 : index
    %c0_14 = arith.constant 0 : index
    %81 = vector.load %arg2[%c0_13, %c0_14] : memref<3x128xf32, #tpu.memory_space<vmem>>, vector<3x128xf32>
    tpu.vector_store %arg2[%c0_13, %c0_14], %80 {strides = array<i32>} : memref<3x128xf32, #tpu.memory_space<vmem>>, vector<3x128xf32>,
    return
  }
  func.func @transform_0(%arg0: i32) -> (i32, i32) {
    %c0_i32 = arith.constant 0 : i32
    %c0_i32_0 = arith.constant 0 : i32
    return %c0_i32, %arg0 : i32, i32
  }
  func.func @transform_1(%arg0: i32) -> (i32, i32) {
    %c0_i32 = arith.constant 0 : i32
    %c0_i32_0 = arith.constant 0 : i32
    return %c0_i32, %arg0 : i32, i32
  }
}

</mosaic_0001>

<bundles_post_ra>
// kernel: tpu_custom_call.1
= control target key start
LH: loop header
LB: loop body
LE: loop exit
PB: predicated region body
PF: predicated region fallthrough
CT: control target
= control target key end

     0   :  { %6 = vsyncpa [#allocation3], 0  ;;  %s256_s0 = inlined_call_operand.hbm [shape: f32[16,128], index: 0, kind: input, shape index: {}]   ;;  %s257_s1 = inlined_call_operand.hbm [shape: f32[3,128], index: 1, kind: output, shape index: {}]  }
   0x1   :  { %7 = vsyncpa [#allocation4], 0  ;;  %s12_s8 = sshll.u32 %s256_s0, 4  ;;  %s206_s9 = smov [#allocation2]   ;;  %s13_s8 = int_to_ptr.hbm [resolvable:$true] %s12_s8 }
   0x2   :  { %s14_s10 = sshll.u32 %s206_s9, 4  ;;  %s207_s11 = smov 128   ;;  %s15_s10 = int_to_ptr.vmem [resolvable:$true] %s14_s10 }
   0x3   :  { %s208_s12 = smov 8  }
   0x4   :  { %20 = dma.hbm_to_vmem [thread:$0]  %s13_s8, 256, %s15_s10, [#allocation3], %s207_s11, %s207_s11, %s208_s12  }
   0x5   :  { %202 = dma.done.wait [#allocation3], 256  }
   0x6   :  { %203 = vsyncadd [#allocation3], 4294967040  ;;  %v25_v0 = vld [vmem:[#allocation2] sm:$0xff]  ;;  %v26_v1 = vld [vmem:[#allocation2 + $0x8] sm:$0xff]  ;;  %v27_v4 = vlaneseq  ;;  %v209_v55 = vmov 0   ;;  %s210_s0 = smov [#allocation5]  }
   0x7   :  { %v30_v2 = vmax.f32 %v25_v0, %v26_v1  ;;  %s135_s13 = sshll.u32 %s210_s0, 4  ;;  %s137_s16 = sshll.u32 %s257_s1, 4  ;;  %s136_s13 = int_to_ptr.vmem [resolvable:$true] %s135_s13  ;;  %s138_s16 = int_to_ptr.hbm [resolvable:$true] %s137_s16 }
   0x8   :  { %v224_v7 = vshrl.u32 %v27_v4, 7 }
   0x9   :  { %v31_v3 = vrot.slane %v30_v2, 4 }
   0xa   :  { %v29_v10 = vadd.s32 8, %v224_v7 }
   0xb   :  { %v32_v5 = vmax.f32 %v30_v2, %v31_v3 }
   0xd   :  { %v33_v6 = vrot.slane %v32_v5, 2 }
   0xf   :  { %v34_v8 = vmax.f32 %v32_v5, %v33_v6 }
  0x11   :  { %v35_v9 = vrot.slane %v34_v8, 1 }
  0x13   :  { %v227_v11 = vmax.f32 %v34_v8, %v35_v9 }
  0x15   :  { %vm37_vm0 = vcmp.eq.f32.partialorder %v25_v0, %v227_v11  ;;  %vm38_vm1 = vcmp.eq.f32.partialorder %v26_v1, %v227_v11 }
  0x16   :  { %v39_v12 = vsel %vm37_vm0, %v224_v7, 16  ;;  %v40_v13 = vsel %vm38_vm1, %v29_v10, 16 }
  0x17   :  { %vm41_vm2 = vcmp.lt.s32.totalorder %v39_v12, %v40_v13 }
  0x18   :  { %v42_v14 = vsel %vm41_vm2, %v39_v12, %v40_v13 }
  0x19   :  { %v43_v15 = vrot.slane %v42_v14, 4 }
  0x1b   :  { %vm44_vm3 = vcmp.lt.s32.totalorder %v42_v14, %v43_v15 }
  0x1c   :  { %v45_v16 = vsel %vm44_vm3, %v42_v14, %v43_v15 }
  0x1d   :  { %v46_v17 = vrot.slane %v45_v16, 2 }
  0x1f   :  { %vm47_vm4 = vcmp.lt.s32.totalorder %v45_v16, %v46_v17 }
  0x20   :  { %v48_v18 = vsel %vm47_vm4, %v45_v16, %v46_v17 }
  0x21   :  { %v49_v19 = vrot.slane %v48_v18, 1 }
  0x23   :  { %vm50_vm5 = vcmp.lt.s32.totalorder %v48_v18, %v49_v19 }
  0x24   :  { %v232_v20 = vsel %vm50_vm5, %v48_v18, %v49_v19 }
  0x25   :  { %vm52_vm6 = vcmp.eq.s32.totalorder %v224_v7, %v232_v20  ;;  %vm53_vm7 = vcmp.eq.s32.totalorder %v29_v10, %v232_v20 }
  0x26   :  { %v54_v21 = vsel %vm52_vm6, -inf, %v25_v0  ;;  %v55_v22 = vsel %vm53_vm7, -inf, %v26_v1 }
  0x27   :  { %v56_v23 = vmax.f32 %v54_v21, %v55_v22 }
  0x29   :  { %v57_v24 = vrot.slane %v56_v23, 4 }
  0x2b   :  { %v58_v25 = vmax.f32 %v56_v23, %v57_v24 }
  0x2d   :  { %v59_v26 = vrot.slane %v58_v25, 2 }
  0x2f   :  { %v60_v27 = vmax.f32 %v58_v25, %v59_v26 }
  0x31   :  { %v61_v28 = vrot.slane %v60_v27, 1 }
  0x33   :  { %v237_v29 = vmax.f32 %v60_v27, %v61_v28 }
  0x35   :  { %vm63_vm8 = vcmp.eq.f32.partialorder %v54_v21, %v237_v29  ;;  %vm64_vm9 = vcmp.eq.f32.partialorder %v55_v22, %v237_v29 }
  0x36   :  { %v65_v30 = vsel %vm63_vm8, %v224_v7, 16  ;;  %v66_v31 = vsel %vm64_vm9, %v29_v10, 16 }
  0x37   :  { %vm67_vm10 = vcmp.lt.s32.totalorder %v65_v30, %v66_v31 }
  0x38   :  { %v68_v32 = vsel %vm67_vm10, %v65_v30, %v66_v31 }
  0x39   :  { %v69_v33 = vrot.slane %v68_v32, 4 }
  0x3b   :  { %vm70_vm11 = vcmp.lt.s32.totalorder %v68_v32, %v69_v33 }
  0x3c   :  { %v71_v34 = vsel %vm70_vm11, %v68_v32, %v69_v33 }
  0x3d   :  { %v72_v35 = vrot.slane %v71_v34, 2 }
  0x3f   :  { %vm73_vm12 = vcmp.lt.s32.totalorder %v71_v34, %v72_v35 }
  0x40   :  { %v74_v36 = vsel %vm73_vm12, %v71_v34, %v72_v35 }
  0x41   :  { %v75_v37 = vrot.slane %v74_v36, 1 }
  0x43   :  { %vm76_vm13 = vcmp.lt.s32.totalorder %v74_v36, %v75_v37 }
  0x44   :  { %v77_v38 = vsel %vm76_vm13, %v74_v36, %v75_v37 }
  0x45   :  { %vm78_vm14 = vcmp.eq.s32.totalorder %v224_v7, %v77_v38  ;;  %vm79_vm15 = vcmp.eq.s32.totalorder %v29_v10, %v77_v38  ;;  %vm104_vm4 = vcmp.le.s32.totalorder %v77_v38, %v232_v20  ;;  %vm110_vm5 = vcmp.le.s32.totalorder %v232_v20, %v77_v38 }
  0x46   :  { %v80_v39 = vsel %vm78_vm14, -inf, %v54_v21  ;;  %v81_v40 = vsel %vm79_vm15, -inf, %v55_v22  ;;  %v105_v56 = vsel %vm104_vm4, 1, %v209_v55  ;;  %v111_v57 = vsel %vm110_vm5, 1, %v209_v55 }
  0x47   :  { %v82_v41 = vmax.f32 %v80_v39, %v81_v40  ;;  %v106_v59 = vadd.s32 1, %v105_v56  ;;  %v112_v60 = vadd.s32 1, %v111_v57 }
  0x49   :  { %v83_v42 = vrot.slane %v82_v41, 4 }
  0x4b   :  { %v84_v43 = vmax.f32 %v82_v41, %v83_v42 }
  0x4d   :  { %v85_v44 = vrot.slane %v84_v43, 2 }
  0x4f   :  { %v86_v45 = vmax.f32 %v84_v43, %v85_v44 }
  0x51   :  { %v87_v46 = vrot.slane %v86_v45, 1 }
  0x53   :  { %v88_v47 = vmax.f32 %v86_v45, %v87_v46 }
  0x55   :  { %vm89_vm0 = vcmp.eq.f32.partialorder %v80_v39, %v88_v47  ;;  %vm90_vm1 = vcmp.eq.f32.partialorder %v81_v40, %v88_v47 }
  0x56   :  { %v91_v48 = vsel %vm89_vm0, %v224_v7, 16  ;;  %v92_v49 = vsel %vm90_vm1, %v29_v10, 16 }
  0x57   :  { %vm93_vm2 = vcmp.lt.s32.totalorder %v91_v48, %v92_v49 }
  0x58   :  { %v94_v50 = vsel %vm93_vm2, %v91_v48, %v92_v49 }
  0x59   :  { %v95_v51 = vrot.slane %v94_v50, 4 }
  0x5b   :  { %vm96_vm3 = vcmp.lt.s32.totalorder %v94_v50, %v95_v51 }
  0x5c   :  { %v97_v52 = vsel %vm96_vm3, %v94_v50, %v95_v51 }
  0x5d   :  { %v98_v53 = vrot.slane %v97_v52, 2 }
  0x5f   :  { %vm99_vm6 = vcmp.lt.s32.totalorder %v97_v52, %v98_v53 }
  0x60   :  { %v100_v54 = vsel %vm99_vm6, %v97_v52, %v98_v53 }
  0x61   :  { %v101_v58 = vrot.slane %v100_v54, 1 }
  0x63   :  { %vm102_vm7 = vcmp.lt.s32.totalorder %v100_v54, %v101_v58 }
  0x64   :  { %v103_v61 = vsel %vm102_vm7, %v100_v54, %v101_v58 }
  0x65   :  { %vm107_vm8 = vcmp.le.s32.totalorder %v103_v61, %v232_v20  ;;  %vm113_vm9 = vcmp.le.s32.totalorder %v103_v61, %v77_v38  ;;  %vm116_vm10 = vcmp.le.s32.totalorder %v232_v20, %v103_v61  ;;  %vm118_vm11 = vcmp.le.s32.totalorder %v77_v38, %v103_v61 }
  0x66   :  { %v108_v62 = vsel %vm107_vm8, 1, %v209_v55  ;;  %v114_v63 = vsel %vm113_vm9, 1, %v209_v55  ;;  %v117_v0 = vsel %vm116_vm10, 1, %v209_v55  ;;  %v119_v1 = vsel %vm118_vm11, 1, %v209_v55 }
  0x67   :  { %v109_v2 = vadd.s32 %v108_v62, %v106_v59  ;;  %v115_v3 = vadd.s32 %v114_v63, %v112_v60  ;;  %v120_v4 = vadd.s32 %v119_v1, %v117_v0 }
  0x69   :  { %v147_v5 = vadd.s32 4294967295, %v109_v2  ;;  %v148_v6 = vadd.s32 4294967295, %v115_v3  ;;  %vm127_vm14 = vcmp.eq.s32.totalorder %v224_v7, %v120_v4 }
  0x6b   :  { %vm122_vm12 = vcmp.eq.s32.totalorder %v224_v7, %v147_v5  ;;  %vm125_vm13 = vcmp.eq.s32.totalorder %v224_v7, %v148_v6 }
  0x6c   :  { %v123_v8 = vsel %vm122_vm12, %v227_v11, 0.0 }
  0x6d   :  { %v126_v9 = vsel %vm125_vm13, %v237_v29, %v123_v8 }
  0x6e   :  { %v128_v10 = vsel %vm127_vm14, %v88_v47, %v126_v9 }
  0x6f   :  { %129 = vst [vmem:[#allocation5] sm:$0x7] %v128_v10 }
  0x70   :  { %140 = dma.vmem_to_hbm [thread:$0]  %s136_s13, 64, %s138_s16, [#allocation4]  }
  0x71   :  { %204 = dma.done.wait [#allocation4], 64  }
  0x72   :  { %205 = vsyncadd [#allocation4], 4294967232 }
  0x73   :  { %145 = vsyncpa [#allocation3], 1 }
  0x74   :  { %146 = vsyncpa [#allocation4], 1 }

</bundles_post_ra>
